<compile_context>
chip_gen: v7x
topology: tpu7x:2x2x1
jax: 0.10.0
libtpu: 0.0.40
codegen_flags: <defaults>
</compile_context>

<pallas_src>
import functools

import jax
import jax.numpy as jnp
from jax import lax
from jax.experimental import pallas as pl
from jax.experimental.pallas import tpu as pltpu


def _proto_logits_kernel(x_ref, wt_ref, o_ref, *, inv_t, eps):
    # x_ref  : (B, D)        f32, resident across all grid steps
    # wt_ref : (D, tile_q)   bf16, one streamed tile of the transposed prototypes
    # o_ref  : (B, tile_q)   f32 logits tile
    x = x_ref[...].astype(jnp.float32)
    # F.normalize(x): row-wise L2 normalization (tiny; recomputed per step is free).
    inv_norm = lax.rsqrt(jnp.sum(x * x, axis=-1, keepdims=True) + eps)
    xn = (x * inv_norm).astype(jnp.bfloat16)
    # MXU-native contraction: [B, D] x [D, tile_q], f32 accumulate.
    logits = lax.dot_general(
        xn, wt_ref[...],
        dimension_numbers=(((1,), (0,)), ((), ())),
        preferred_element_type=jnp.float32,
    )
    o_ref[...] = (logits * inv_t).astype(o_ref.dtype)
    # TODO(synk): when the softmax / Sinkhorn consumer is colocated, fuse it here
    # (EUP exp + f32 VMEM row accumulators) so the [B, Q] logits never round-trip HBM.


def proto_cls_forward(x, weight, temp=0.05, tile_q=512, use_pallas=None):
    """UniOT ProtoCLS.forward: F.normalize(x) @ weight.T / temp.

    x      : [B, D]  float32 features
    weight : [Q, D]  prototype matrix (nn.Linear weight layout, rows ~unit-norm)
    returns: [B, Q]  float32 logits
    """
    B, D = x.shape
    Q, D2 = weight.shape
    assert D == D2, "feature dims must match"

    if use_pallas is None:
        # For tiny prototype banks the pallas_call launch + pipeline warmup
        # exceeds the DMA time; let XLA handle it.
        use_pallas = Q * D >= (1 << 20)
    if not use_pallas:
        xn = x / jnp.maximum(jnp.linalg.norm(x, axis=-1, keepdims=True), 1e-12)
        return (xn @ weight.T) / temp

    # Pre-transposed bf16 stream. In production keep the prototype/queue buffer
    # stored as [D, Q] bf16 so this transpose+cast never materializes.
    wt = weight.T.astype(jnp.bfloat16)              # [D, Q]

    # Effective tile + zero-padded tail so tile_q need not divide Q.
    tile_q = max(128, min(tile_q, pl.cdiv(Q, 128) * 128))
    q_pad = pl.cdiv(Q, tile_q) * tile_q
    if q_pad != Q:
        wt = jnp.pad(wt, ((0, 0), (0, q_pad - Q)))

    grid = (q_pad // tile_q,)
    kernel = functools.partial(
        _proto_logits_kernel, inv_t=1.0 / temp, eps=1e-24)

    cost = pl.CostEstimate(
        flops=2 * B * D * q_pad,
        transcendentals=B * grid[0],
        bytes_accessed=B * D * 4 + D * q_pad * 2 + B * q_pad * 4,
    )

    out = pl.pallas_call(
        kernel,
        out_shape=jax.ShapeDtypeStruct((B, q_pad), jnp.float32),
        grid=grid,
        in_specs=[
            # x is tiny: keep the full (B, D) block resident every grid step.
            pl.BlockSpec((B, D), lambda j: (0, 0)),
            # Stream transposed prototype tiles of shape (D, tile_q) in bf16.
            pl.BlockSpec((D, tile_q), lambda j: (0, j)),
        ],
        out_specs=pl.BlockSpec((B, tile_q), lambda j: (0, j)),
        compiler_params=pltpu.CompilerParams(
            dimension_semantics=("parallel",),
        ),
        cost_estimate=cost,
    )(x.astype(jnp.float32), wt)

    return out[:, :Q] if q_pad != Q else out


if __name__ == "__main__":
    # Sizes consistent with UniOT: feature_dim=256, cluster_head with K
    # prototypes, temp=0.05. Small, but large enough for a 2-step parallel grid.
    feat_dim = 256
    K = 1024          # number of cluster prototypes (out_dim of cluster_head)
    batch = 8
    temp = 0.05

    key = jax.random.PRNGKey(0)
    kx, kw = jax.random.split(key)

    x = jax.random.normal(kx, (batch, feat_dim), dtype=jnp.float32)
    # ProtoCLS.weight_norm(): prototype rows are L2-normalized.
    w = jax.random.normal(kw, (K, feat_dim), dtype=jnp.float32)
    w = w / jnp.linalg.norm(w, axis=1, keepdims=True)

    out = proto_cls_forward(x, w, temp=temp, tile_q=512, use_pallas=True)
    out = jax.block_until_ready(out)
    assert out.shape == (batch, K)

    # Reference with matching bf16 rounding of the dot operands (tight check).
    xn = x / jnp.maximum(jnp.linalg.norm(x, axis=-1, keepdims=True), 1e-12)
    xn_b = xn.astype(jnp.bfloat16).astype(jnp.float32)
    w_b = w.astype(jnp.bfloat16).astype(jnp.float32)
    ref_b = (xn_b @ w_b.T) / temp
    assert jnp.allclose(out, ref_b, atol=5e-2, rtol=1e-2)

    # Loose sanity check against the pure-f32 ProtoCLS math (bf16 streaming
    # error is amplified 20x by 1/temp; still well inside this band).
    ref_f32 = (xn @ w.T) / temp
    assert jnp.allclose(out, ref_f32, atol=2e-1, rtol=5e-2)

    print("KERNEL_OK")
</pallas_src>

<mosaic_0001>
module attributes {stable_mosaic.version = 11 : i64} {
  func.func @_proto_logits_kernel(%arg0: i32, %arg1: memref<8x256xf32, #tpu.memory_space<vmem>>, %arg2: memref<256x512xbf16, #tpu.memory_space<vmem>>, %arg3: memref<8x512xf32, #tpu.memory_space<vmem>>) attributes {dimension_semantics = [#tpu.dimension_semantics<parallel>], iteration_bounds = array<i64: 2>, scalar_prefetch = 0 : i64, scratch_operands = 0 : i64, tpu.core_type = #tpu.core_type<tc>, window_params = [{pipeline_mode = #tpu.pipeline_mode<synchronous>, transform_indices = @transform_0, window_bounds = array<i64: 8, 256>}, {transform_indices = @transform_1, window_bounds = array<i64: 256, 512>}, {transform_indices = @transform_2, window_bounds = array<i64: 8, 512>}]} {
    %c0 = arith.constant 0 : index
    %c0_0 = arith.constant 0 : index
    %0 = vector.load %arg1[%c0, %c0_0] : memref<8x256xf32, #tpu.memory_space<vmem>>, vector<8x256xf32>
    %1 = arith.mulf %0, %0 : vector<8x256xf32>
    %cst = arith.constant dense<0.000000e+00> : vector<8xf32>
    %2 = vector.multi_reduction <add>, %1, %cst [1] : vector<8x256xf32> to vector<8xf32>
    %3 = vector.shape_cast %2 : vector<8xf32> to vector<8x1xf32>
    %cst_1 = arith.constant 1.000000e-24 : f32
    %4 = vector.broadcast %cst_1 : f32 to vector<8x1xf32>
    %5 = arith.addf %3, %4 : vector<8x1xf32>
    %6 = math.rsqrt %5 : vector<8x1xf32>
    %7 = vector.broadcast %6 : vector<8x1xf32> to vector<8x256xf32>
    %8 = arith.mulf %0, %7 : vector<8x256xf32>
    %9 = arith.truncf %8 : vector<8x256xf32> to vector<8x256xbf16>
    %c0_2 = arith.constant 0 : index
    %c0_3 = arith.constant 0 : index
    %10 = vector.load %arg2[%c0_2, %c0_3] : memref<256x512xbf16, #tpu.memory_space<vmem>>, vector<256x512xbf16>
    %cst_4 = arith.constant dense<0.000000e+00> : vector<8x512xf32>
    %11 = tpu.matmul %9, %10, %cst_4 {dimension_numbers = #tpu.dot_dimension_numbers<[1], [0], [0], [1], [0, 0, 1, 1], [], []>} : vector<8x256xbf16>, vector<256x512xbf16>, vector<8x512xf32> -> vector<8x512xf32>
    %cst_5 = arith.constant 2.000000e+01 : f32
    %12 = vector.broadcast %cst_5 : f32 to vector<8x512xf32>
    %13 = arith.mulf %11, %12 : vector<8x512xf32>
    %c0_6 = arith.constant 0 : index
    %c0_7 = arith.constant 0 : index
    %14 = vector.load %arg3[%c0_6, %c0_7] : memref<8x512xf32, #tpu.memory_space<vmem>>, vector<8x512xf32>
    tpu.vector_store %arg3[%c0_6, %c0_7], %13 {strides = array<i32>} : memref<8x512xf32, #tpu.memory_space<vmem>>, vector<8x512xf32>,
    return
  }
  func.func @transform_0(%arg0: i32) -> (i32, i32) {
    %c0_i32 = arith.constant 0 : i32
    %c0_i32_0 = arith.constant 0 : i32
    %c0_i32_1 = arith.constant 0 : i32
    return %c0_i32, %c0_i32_0 : i32, i32
  }
  func.func @transform_1(%arg0: i32) -> (i32, i32) {
    %c0_i32 = arith.constant 0 : i32
    %c0_i32_0 = arith.constant 0 : i32
    return %c0_i32, %arg0 : i32, i32
  }
  func.func @transform_2(%arg0: i32) -> (i32, i32) {
    %c0_i32 = arith.constant 0 : i32
    %c0_i32_0 = arith.constant 0 : i32
    return %c0_i32, %arg0 : i32, i32
  }
}

</mosaic_0001>

<bundles_post_ra>
// kernel: tpu_custom_call.1
= control target key start
LH: loop header
LB: loop body
LE: loop exit
PB: predicated region body
PF: predicated region fallthrough
CT: control target
= control target key end

     0   :  { %7 = vsyncpa [#allocation3], 0  ;;  %s1425_s0 = inlined_call_operand.hbm [shape: f32[8,256], index: 0, kind: input, shape index: {}]   ;;  %s1426_s1 = inlined_call_operand.hbm [shape: bf16[256,1024], index: 1, kind: input, shape index: {}]   ;;  %s1427_s2 = inlined_call_operand.hbm [shape: f32[8,1024], index: 2, kind: output, shape index: {}]  }
   0x1   :  { %8 = vsyncpa [#allocation6], 0 }
   0x2   :  { %10 = vsyncpa [#allocation6 + $0x1], 0 }
   0x3   :  { %11 = vsyncpa [#allocation4], 0 }
   0x4   :  { %13 = vsyncpa [#allocation4 + $0x1], 0  ;;  %s1152_s9 = smov 0   ;;  %s1154_s10 = smov 0  }
   0x5   :  { %s1156_s11 = smov 0   ;;  %s1158_s12 = smov 0  }
   0x6 LB: > { %s1173_s13 = sadd.s32 4294967295, %s1129_s12   ;;  %s761_s14 = sadd.s32 4294967294, %s1129_s12   ;;  %s1129_s12 = sphi %s1158_s12, %s1452_s12   ;;  %s1125_s11 = sphi %s1156_s11, %s1451_s11   ;;  %s1121_s10 = sphi %s1154_s10, %s1450_s10   ;;  %s1117_s9 = sphi %s1152_s9, %s1449_s9  }
   0x7   : > { %s1177_s15 = sadd.s32 1, %s1129_s12   ;;  %s47_s16 = sadd.s32 1, %s1125_s11 }
   0x8   : > { %s44_s17 = ssub.s32 %s1129_s12, %s1177_s15  ;;  %p54_p0 = scmp.ne.s32.totalorder %s1125_s11, %s1121_s10 }
   0x9   : > { %p45_p1 = scmp.eq.s32.totalorder %s44_s17, 0  ;;  %p55_p2 = scmp.eq.s32.totalorder %s1129_s12, 0 }
   0xa   : > { %p60_p3 = scmp.ne.s32.totalorder %s1121_s10, %s1117_s9  ;;  %p1428_p4 = scmp.eq.s32.totalorder %s1173_s13, 0 }
   0xb   : > { %s1189_s18 = scalar_select %p45_p1, %s1125_s11, %s47_s16  }
   0xc   : > { %p1191_p5 = por %p55_p2, %p54_p0  ;;  %p1197_p6 = por %p1428_p4, %p60_p3 }
   0xd   : > { %p84_p7 = scmp.eq.s32.totalorder %s1173_s13, 1  ;;  %p90_p8 = scmp.eq.s32.totalorder %s761_s14, 1 }
   0xe   : > { %s1434_s20 = scalar_select %p1197_p6, 1, 0 }
   0xf   : > { %p762_p9 = scmp.ge.s32.totalorder %s1129_s12, 1  ;;  %p97_p10 = scmp.lt.s32.totalorder %s1129_s12, 3 }
  0x10   : > { %p1204_p11 = por %p84_p7, %p54_p0  ;;  %p1208_p12 = por %p90_p8, %p60_p3 }
  0x11   : > { %p1212_p13 = pnand %p762_p9, %p97_p10  ;;  %s1131_s24 = smov [#allocation2]  }
  0x12   : > { %s1435_s21 = scalar_select %p1204_p11, 1, 0 }
  0x13   : > { %s1436_s22 = scalar_select %p1208_p12, 1, 0 }
  0x14   : > { %s1437_s23 = scalar_select %p1212_p13, 1, 0 }
  0x15   : > { %p851_p2 = pneg %p1212_p13  ;;  %s110_s25 = sshll.u32 %s1131_s24, 4  ;;  %s111_s25 = int_to_ptr.vmem [resolvable:$true] %s110_s25 }
  0x16   : > { %p864_p4 = scmp.lt.s32.totalorder %s1129_s12, 2  ;;  %p1438_p0 = scmp.eq.s32.totalorder %s1173_s13, 0 }
  0x17   : > { %s121_s27 = sand.u32 1, %s1125_s11   ;;  %s1001_s4 = scalar_lea.hbm %s1425_s0, 256 }
  0x18   : > { %p1222_p7 = pnand %p851_p2, %p1438_p0  ;;  %p1229_p3 = pnand %p864_p4, %p1191_p5 }
  0x19   : > { %s765_s29 = sshll.u32 %s121_s27, 9  ;;  %p1002_p8 = scmp.ne.s32.totalorder %s1425_s0, %s1001_s4 }
  0x1a   : > { %s1440_s28 = scalar_select %p1229_p3, 1, 0 }
  0x1b   : > { %p1003_p9 = pneg %p1222_p7  ;;  %p1008_p4 = scmp.lt.u32.totalorder %s1001_s4, %s1425_s0 }
  0x1d   : > { %p1004_p10 = pnand %p1003_p9, %p1002_p8 }
  0x1f   : > { %p1005_p2 = pneg %p1004_p10 }
  0x21   : > { %p1010_p5 = pnand %p1008_p4, %p1005_p2 }
  0x23   : > { %1013 = shalt.err (!%p1010_p5)
}
  0x24   : > { %s1014_s14 = scalar_lea.vmem %s111_s25, 256  ;;  %p1022_p11 = scmp.lt.s32.totalorder %s111_s25, %s111_s25 }
  0x25   : > { %p1015_p0 = scmp.ne.s32.totalorder %s111_s25, %s1014_s14  ;;  %p1023_p6 = scmp.lt.s32.totalorder %s1014_s14, %s1014_s14 }
  0x27   : > { %p1017_p1 = pnand %p1015_p0, %p1003_p9  ;;  %p1024_p13 = por %p1023_p6, %p1022_p11 }
  0x29   : > { %p1018_p12 = pneg %p1017_p1 }
  0x2b   : > { %p1025_p3 = pnand %p1024_p13, %p1018_p12 }
  0x2d   : > { %1028 = shalt.err (!%p1025_p3)
}
  0x2e   : > { %854 = dma.hbm_to_vmem [thread:$0]  (!%p1222_p7), %s1425_s0, 256, %s111_s25, [#allocation3]  }
  0x2f   : > { %s841_s19 = sshll.u32 %s1129_s12, 8  ;;  %s125_s24 = scalar_lea.vmem [#allocation5], %s765_s29 }
  0x30   : > { %s132_s30 = sshll.u32 %s125_s24, 4  ;;  %s1253_s5 = scalar_lea.hbm %s1426_s1, %s841_s19  ;;  %s1255_s30 = int_to_ptr.vmem [resolvable:$true] %s132_s30 }
  0x31   : > { %s1257_s26 = scalar_lea.sflag [#allocation6], %s121_s27  ;;  %s1029_s6 = scalar_lea.hbm %s1253_s5, 8192 }
  0x32   : > { %p1030_p6 = scmp.ne.s32.totalorder %s1253_s5, %s1029_s6  ;;  %p1441_p11 = scmp.ne.s32.totalorder %s1440_s28, 0 }
  0x33   : > { %s1034_s7 = scalar_lea.hbm %s1426_s1, 16384  ;;  %p1035_p7 = scmp.lt.u32.totalorder %s1253_s5, %s1426_s1 }
  0x34   : > { %p1031_p12 = pneg %p1441_p11  ;;  %p1036_p3 = scmp.lt.u32.totalorder %s1034_s7, %s1029_s6 }
  0x35   : > { %p1038_p9 = scmp.lt.u32.totalorder %s1029_s6, %s1253_s5 }
  0x36   : > { %p1032_p13 = pnand %p1031_p12, %p1030_p6  ;;  %p1037_p8 = por %p1036_p3, %p1035_p7 }
  0x38   : > { %p1033_p1 = pneg %p1032_p13  ;;  %p1039_p10 = por %p1038_p9, %p1037_p8 }
  0x3a   : > { %p1040_p2 = pnand %p1039_p10, %p1033_p1 }
  0x3c   : > { %1043 = shalt.err (!%p1040_p2)
}
  0x3d   : > { %s1044_s27 = scalar_lea.vmem %s1255_s30, 8192  ;;  %s1132_s16 = smov [#allocation5]  }
  0x3e   : > { %p1045_p4 = scmp.ne.s32.totalorder %s1255_s30, %s1044_s27  ;;  %s1049_s17 = sshll.u32 %s1132_s16, 4  ;;  %s1050_s17 = int_to_ptr.vmem [resolvable:$false] %s1049_s17 }
  0x3f   : > { %s1051_s19 = scalar_lea.vmem %s1050_s17, 16384  ;;  %p1052_p6 = scmp.lt.s32.totalorder %s1255_s30, %s1050_s17 }
  0x40   : > { %p1047_p5 = pnand %p1045_p4, %p1031_p12  ;;  %p1053_p13 = scmp.lt.s32.totalorder %s1051_s19, %s1044_s27 }
  0x42   : > { %p1048_p0 = pneg %p1047_p5  ;;  %p1054_p7 = por %p1053_p13, %p1052_p6 }
  0x44   : > { %p1055_p3 = pnand %p1054_p7, %p1048_p0 }
  0x46   : > { %1058 = shalt.err (!%p1055_p3)
}
  0x47   : > { %s1133_s24 = smov 512   ;;  %s1134_s3 = smov 256  }
  0x48   : > { %s1135_s4 = smov 16   ;;  %p1442_p12 = scmp.ne.s32.totalorder %s1437_s23, 0 }
  0x49   : > { %858 = dma.hbm_to_vmem [thread:$0]  (!%p1441_p11), %s1253_s5, 8192, %s1255_s30, %s1257_s26, %s1133_s24, %s1134_s3, %s1135_s4  }
  0x4a   : > { %144 = sbr.rel (%p1442_p12) target bundleno = 480 (0x1e0), region = 28  ;;  %p1443_p1 = scmp.eq.s32.totalorder (!%p1442_p12), %s1173_s13, 0 }
  0x51   : > { %1104 = dma.done.wait (%p1443_p1), [#allocation3], 256   ;;  %p1444_p8 = pmov %p1443_p1 }
  0x52   : > { %s1292_s6 = sand.u32 1, %s1121_s10   ;;  %p1445_p11 = scmp.ne.s32.totalorder %s1434_s20, 0 }
  0x53   : > { %1106 = vsyncadd (%p1444_p8), [#allocation3], 4294967040  ;;  %s770_s25 = sshll.u32 %s1292_s6, 9  ;;  %s151_s29 = scalar_lea.sflag [#allocation6], %s1292_s6 }
  0x54   : > { %s1296_s7 = scalar_lea.vmem [#allocation5], %s770_s25 }
  0x55   : > { %1108 = dma.done.wait (%p1445_p11), %s151_s29, 8192  }
  0x56   : > { %1110 = vsyncadd (%p1445_p11), %s151_s29, 4294959104  ;;  %v1302_v0 = vld [vmem:[#allocation2] sm:$0xff]  ;;  %v1304_v1 = vld [vmem:[#allocation2 + $0x8] sm:$0xff]  ;;  %s771_s20 = sshll.u32 %s1292_s6, 5  ;;  %s842_s23 = sshll.u32 %s1173_s13, 9 }
  0x57   : > { %v179_v2 = vmul.f32 %v1302_v0, %v1302_v0  ;;  %v180_v3 = vmul.f32 %v1304_v1, %v1304_v1  ;;  %v903_v4 = vld [vmem:[%s1296_s7 + $0x4] ss:$16 sps:$4 sm:$0xff]   ;;  %v905_v5 = vld [vmem:[%s1296_s7 + $0xc] ss:$16 sps:$4 sm:$0xff]   ;;  %v907_v6 = vld [vmem:[%s1296_s7] ss:$16 sps:$4 sm:$0xff]   ;;  %s1381_s8 = scalar_lea.hbm %s1427_s2, %s842_s23 }
  0x58   : > { %574 = vmatprep.subr.bf16.mxu0 %v903_v4  ;;  %v908_v8 = vld [vmem:[%s1296_s7 + $0x8] ss:$16 sps:$4 sm:$0xff]   ;;  %615 = vmatprep.subr.bf16.mxu1 %v905_v5  ;;  %v909_v9 = vld [vmem:[%s1296_s7 + $0x24] ss:$16 sps:$4 sm:$0xff]   ;;  %v911_v10 = vld [vmem:[%s1296_s7 + $0x2c] ss:$16 sps:$4 sm:$0xff]  }
  0x59   : > { %v181_v7 = vadd.f32 %v180_v3, %v179_v2  ;;  %575 = vmatpush1.bf16.msra.mxu0 %v907_v6  ;;  %616 = vmatpush1.bf16.msra.mxu1 %v908_v8  ;;  %v913_v11 = vld [vmem:[%s1296_s7 + $0x20] ss:$16 sps:$4 sm:$0xff]   ;;  %v914_v12 = vld [vmem:[%s1296_s7 + $0x28] ss:$16 sps:$4 sm:$0xff]   ;;  %v915_v13 = vld [vmem:[%s1296_s7 + $0x44] ss:$16 sps:$4 sm:$0xff]  }
  0x5a   : > { %576 = vmatprep.subr.bf16.mxu0 %v909_v9  ;;  %617 = vmatprep.subr.bf16.mxu1 %v911_v10  ;;  %v917_v14 = vld [vmem:[%s1296_s7 + $0x4c] ss:$16 sps:$4 sm:$0xff]   ;;  %v919_v15 = vld [vmem:[%s1296_s7 + $0x40] ss:$16 sps:$4 sm:$0xff]   ;;  %v920_v16 = vld [vmem:[%s1296_s7 + $0x48] ss:$16 sps:$4 sm:$0xff]  }
  0x5b   : > { %182 = vadd.xlane.f32.xlu0 %v181_v7  ;;  %v921_v17 = vld [vmem:[%s1296_s7 + $0x64] ss:$16 sps:$4 sm:$0xff]   ;;  %v923_v18 = vld [vmem:[%s1296_s7 + $0x6c] ss:$16 sps:$4 sm:$0xff]   ;;  %v925_v19 = vld [vmem:[%s1296_s7 + $0x60] ss:$16 sps:$4 sm:$0xff]  }
  0x5c   : > { %v926_v20 = vld [vmem:[%s1296_s7 + $0x68] ss:$16 sps:$4 sm:$0xff]   ;;  %v927_v21 = vld [vmem:[%s1296_s7 + $0x84] ss:$16 sps:$4 sm:$0xff]   ;;  %v929_v22 = vld [vmem:[%s1296_s7 + $0x8c] ss:$16 sps:$4 sm:$0xff]  }
  0x5d   : > { %577 = vmatpush1.bf16.msra.mxu0 %v913_v11  ;;  %618 = vmatpush1.bf16.msra.mxu1 %v914_v12  ;;  %v931_v23 = vld [vmem:[%s1296_s7 + $0x80] ss:$16 sps:$4 sm:$0xff]   ;;  %v932_v24 = vld [vmem:[%s1296_s7 + $0x88] ss:$16 sps:$4 sm:$0xff]   ;;  %v933_v25 = vld [vmem:[%s1296_s7 + $0xa4] ss:$16 sps:$4 sm:$0xff]  }
  0x5e   : > { %578 = vmatprep.subr.bf16.mxu0 %v915_v13  ;;  %619 = vmatprep.subr.bf16.mxu1 %v917_v14  ;;  %v935_v26 = vld [vmem:[%s1296_s7 + $0xac] ss:$16 sps:$4 sm:$0xff]   ;;  %v937_v27 = vld [vmem:[%s1296_s7 + $0xa0] ss:$16 sps:$4 sm:$0xff]   ;;  %v938_v28 = vld [vmem:[%s1296_s7 + $0xa8] ss:$16 sps:$4 sm:$0xff]  }
  0x5f   : > { %v939_v29 = vld [vmem:[%s1296_s7 + $0xc4] ss:$16 sps:$4 sm:$0xff]   ;;  %v941_v30 = vld [vmem:[%s1296_s7 + $0xcc] ss:$16 sps:$4 sm:$0xff]   ;;  %v943_v31 = vld [vmem:[%s1296_s7 + $0xc0] ss:$16 sps:$4 sm:$0xff]  }
  0x60   : > { %v944_v32 = vld [vmem:[%s1296_s7 + $0xc8] ss:$16 sps:$4 sm:$0xff]   ;;  %v945_v33 = vld [vmem:[%s1296_s7 + $0xe4] ss:$16 sps:$4 sm:$0xff]   ;;  %v947_v34 = vld [vmem:[%s1296_s7 + $0xec] ss:$16 sps:$4 sm:$0xff]  }
  0x61   : > { %579 = vmatpush1.bf16.msra.mxu0 %v919_v15  ;;  %620 = vmatpush1.bf16.msra.mxu1 %v920_v16  ;;  %v949_v35 = vld [vmem:[%s1296_s7 + $0xe0] ss:$16 sps:$4 sm:$0xff]   ;;  %v950_v36 = vld [vmem:[%s1296_s7 + $0xe8] ss:$16 sps:$4 sm:$0xff]   ;;  %v951_v37 = vld [vmem:[%s1296_s7 + $0x104] ss:$16 sps:$4 sm:$0xff]  }
  0x62   : > { %580 = vmatprep.subr.bf16.mxu0 %v921_v17  ;;  %621 = vmatprep.subr.bf16.mxu1 %v923_v18  ;;  %v953_v38 = vld [vmem:[%s1296_s7 + $0x10c] ss:$16 sps:$4 sm:$0xff]   ;;  %v955_v39 = vld [vmem:[%s1296_s7 + $0x100] ss:$16 sps:$4 sm:$0xff]   ;;  %v956_v40 = vld [vmem:[%s1296_s7 + $0x108] ss:$16 sps:$4 sm:$0xff]  }
  0x63   : > { %v957_v41 = vld [vmem:[%s1296_s7 + $0x124] ss:$16 sps:$4 sm:$0xff]   ;;  %v959_v42 = vld [vmem:[%s1296_s7 + $0x12c] ss:$16 sps:$4 sm:$0xff]   ;;  %v961_v43 = vld [vmem:[%s1296_s7 + $0x120] ss:$16 sps:$4 sm:$0xff]  }
  0x64   : > { %v962_v44 = vld [vmem:[%s1296_s7 + $0x128] ss:$16 sps:$4 sm:$0xff]   ;;  %v963_v45 = vld [vmem:[%s1296_s7 + $0x144] ss:$16 sps:$4 sm:$0xff]   ;;  %v965_v46 = vld [vmem:[%s1296_s7 + $0x14c] ss:$16 sps:$4 sm:$0xff]  }
  0x65   : > { %581 = vmatpush1.bf16.msra.mxu0 %v925_v19  ;;  %622 = vmatpush1.bf16.msra.mxu1 %v926_v20  ;;  %v967_v47 = vld [vmem:[%s1296_s7 + $0x140] ss:$16 sps:$4 sm:$0xff]   ;;  %v968_v48 = vld [vmem:[%s1296_s7 + $0x148] ss:$16 sps:$4 sm:$0xff]   ;;  %v969_v49 = vld [vmem:[%s1296_s7 + $0x164] ss:$16 sps:$4 sm:$0xff]  }
  0x66   : > { %582 = vmatprep.subr.bf16.mxu0 %v927_v21  ;;  %623 = vmatprep.subr.bf16.mxu1 %v929_v22  ;;  %v971_v50 = vld [vmem:[%s1296_s7 + $0x16c] ss:$16 sps:$4 sm:$0xff]   ;;  %v973_v51 = vld [vmem:[%s1296_s7 + $0x160] ss:$16 sps:$4 sm:$0xff]   ;;  %v974_v52 = vld [vmem:[%s1296_s7 + $0x168] ss:$16 sps:$4 sm:$0xff]  }
  0x67   : > { %v975_v53 = vld [vmem:[%s1296_s7 + $0x184] ss:$16 sps:$4 sm:$0xff]   ;;  %v977_v54 = vld [vmem:[%s1296_s7 + $0x18c] ss:$16 sps:$4 sm:$0xff]   ;;  %v979_v55 = vld [vmem:[%s1296_s7 + $0x180] ss:$16 sps:$4 sm:$0xff]  }
  0x68   : > { %v980_v56 = vld [vmem:[%s1296_s7 + $0x188] ss:$16 sps:$4 sm:$0xff]   ;;  %v981_v57 = vld [vmem:[%s1296_s7 + $0x1a4] ss:$16 sps:$4 sm:$0xff]   ;;  %v983_v58 = vld [vmem:[%s1296_s7 + $0x1ac] ss:$16 sps:$4 sm:$0xff]  }
  0x69   : > { %583 = vmatpush1.bf16.msra.mxu0 %v931_v23  ;;  %624 = vmatpush1.bf16.msra.mxu1 %v932_v24  ;;  %v985_v59 = vld [vmem:[%s1296_s7 + $0x1a0] ss:$16 sps:$4 sm:$0xff]   ;;  %v986_v60 = vld [vmem:[%s1296_s7 + $0x1a8] ss:$16 sps:$4 sm:$0xff]   ;;  %v987_v61 = vld [vmem:[%s1296_s7 + $0x1c4] ss:$16 sps:$4 sm:$0xff]  }
  0x6a   : > { %584 = vmatprep.subr.bf16.mxu0 %v933_v25  ;;  %625 = vmatprep.subr.bf16.mxu1 %v935_v26  ;;  %v989_v62 = vld [vmem:[%s1296_s7 + $0x1cc] ss:$16 sps:$4 sm:$0xff]   ;;  %v991_v63 = vld [vmem:[%s1296_s7 + $0x1c0] ss:$16 sps:$4 sm:$0xff]   ;;  %v992_v2 = vld [vmem:[%s1296_s7 + $0x1c8] ss:$16 sps:$4 sm:$0xff]  }
  0x6b   : > { %v993_v3 = vld [vmem:[%s1296_s7 + $0x1e4] ss:$16 sps:$4 sm:$0xff]   ;;  %v995_v4 = vld [vmem:[%s1296_s7 + $0x1ec] ss:$16 sps:$4 sm:$0xff]   ;;  %v997_v5 = vld [vmem:[%s1296_s7 + $0x1e0] ss:$16 sps:$4 sm:$0xff]  }
  0x6c   : > { %v998_v6 = vld [vmem:[%s1296_s7 + $0x1e8] ss:$16 sps:$4 sm:$0xff]   ;;  %s174_s28 = scalar_lea.vmem [#allocation7], %s771_s20  ;;  %s665_s13 = scalar_lea.sflag [#allocation4], %s1292_s6 }
  0x6d   : > { %585 = vmatpush1.bf16.msra.mxu0 %v937_v27  ;;  %626 = vmatpush1.bf16.msra.mxu1 %v938_v28  ;;  %s679_s30 = sshll.u32 %s174_s28, 4  ;;  %p1446_p10 = scmp.ne.s32.totalorder %s1435_s21, 0  ;;  %s1383_s30 = int_to_ptr.vmem [resolvable:$true] %s679_s30 }
  0x6e   : > { %586 = vmatprep.subr.bf16.mxu0 %v939_v29  ;;  %627 = vmatprep.subr.bf16.mxu1 %v941_v30  ;;  %s1059_s14 = scalar_lea.vmem %s1383_s30, 512  ;;  %s1136_s27 = smov [#allocation7]  }
  0x6f   : > { %p1060_p9 = scmp.ne.s32.totalorder %s1383_s30, %s1059_s14  ;;  %s1063_s16 = sshll.u32 %s1136_s27, 4  ;;  %s1064_s16 = int_to_ptr.vmem [resolvable:$false] %s1063_s16 }
  0x70   : > { %s1065_s17 = scalar_lea.vmem %s1064_s16, 1024  ;;  %p1066_p5 = scmp.lt.s32.totalorder %s1383_s30, %s1064_s16 }
  0x71   : > { %587 = vmatpush1.bf16.msra.mxu0 %v943_v31  ;;  %628 = vmatpush1.bf16.msra.mxu1 %v944_v32  ;;  %p1061_p2 = pnand %p1060_p9, %p1446_p10  ;;  %p1067_p0 = scmp.lt.s32.totalorder %s1065_s17, %s1059_s14 }
  0x72   : > { %588 = vmatprep.subr.bf16.mxu0 %v945_v33  ;;  %629 = vmatprep.subr.bf16.mxu1 %v947_v34 }
  0x73   : > { %p1062_p4 = pneg %p1061_p2  ;;  %p1068_p6 = por %p1067_p0, %p1066_p5 }
  0x75   : > { %589 = vmatpush1.bf16.msra.mxu0 %v949_v35  ;;  %630 = vmatpush1.bf16.msra.mxu1 %v950_v36  ;;  %p1069_p13 = pnand %p1068_p6, %p1062_p4 }
  0x76   : > { %590 = vmatprep.subr.bf16.mxu0 %v951_v37  ;;  %631 = vmatprep.subr.bf16.mxu1 %v953_v38 }
  0x79   : > { %591 = vmatpush1.bf16.msra.mxu0 %v955_v39  ;;  %632 = vmatpush1.bf16.msra.mxu1 %v956_v40 }
  0x7a   : > { %592 = vmatprep.subr.bf16.mxu0 %v957_v41  ;;  %633 = vmatprep.subr.bf16.mxu1 %v959_v42 }
  0x7d   : > { %593 = vmatpush1.bf16.msra.mxu0 %v961_v43  ;;  %634 = vmatpush1.bf16.msra.mxu1 %v962_v44 }
  0x7e   : > { %594 = vmatprep.subr.bf16.mxu0 %v963_v45  ;;  %635 = vmatprep.subr.bf16.mxu1 %v965_v46 }
  0x81   : > { %595 = vmatpush1.bf16.msra.mxu0 %v967_v47  ;;  %636 = vmatpush1.bf16.msra.mxu1 %v968_v48 }
  0x82   : > { %596 = vmatprep.subr.bf16.mxu0 %v969_v49  ;;  %637 = vmatprep.subr.bf16.mxu1 %v971_v50 }
  0x85   : > { %597 = vmatpush1.bf16.msra.mxu0 %v973_v51  ;;  %638 = vmatpush1.bf16.msra.mxu1 %v974_v52 }
  0x86   : > { %598 = vmatprep.subr.bf16.mxu0 %v975_v53  ;;  %639 = vmatprep.subr.bf16.mxu1 %v977_v54 }
  0x89   : > { %599 = vmatpush1.bf16.msra.mxu0 %v979_v55  ;;  %640 = vmatpush1.bf16.msra.mxu1 %v980_v56 }
  0x8a   : > { %600 = vmatprep.subr.bf16.mxu0 %v981_v57  ;;  %641 = vmatprep.subr.bf16.mxu1 %v983_v58 }
  0x8d   : > { %601 = vmatpush1.bf16.msra.mxu0 %v985_v59  ;;  %642 = vmatpush1.bf16.msra.mxu1 %v986_v60 }
  0x8e   : > { %602 = vmatprep.subr.bf16.mxu0 %v987_v61  ;;  %643 = vmatprep.subr.bf16.mxu1 %v989_v62 }
  0x91   : > { %603 = vmatpush1.bf16.msra.mxu0 %v991_v63  ;;  %644 = vmatpush1.bf16.msra.mxu1 %v992_v2 }
  0x92   : > { %604 = vmatprep.subr.bf16.mxu0 %v993_v3  ;;  %645 = vmatprep.subr.bf16.mxu1 %v995_v4 }
  0x95   : > { %605 = vmatpush1.bf16.msra.mxu0 %v997_v5  ;;  %646 = vmatpush1.bf16.msra.mxu1 %v998_v6 }
  0xe8   : > { %v183_v7 = vpop.xlane.xlu0 %182 }
  0xe9   : > { %v184_v8 = vadd.f32 1e-24, %v183_v7 }
  0xeb   : > { %999 = vrsqrt.f32 %v184_v8 }
  0xf5   : > { %v1000_v9 = vpop.eup %999 }
  0xf6   : > { %v187_v10 = vmul.f32 %v1000_v9, %v1304_v1  ;;  %v186_v11 = vmul.f32 %v1000_v9, %v1302_v0 }
  0xf8   : > { %v189_v12 = vpack.c.bf16 %v187_v10, %v187_v10  ;;  %v188_v13 = vpack.c.bf16 %v186_v11, %v186_v11 }
  0xfa   : > { %606 = vmatprep.mubr.bf16.mxu0 %v189_v12  ;;  %647 = vmatprep.mubr.bf16.mxu1 %v189_v12 }
  0xfb   : > { %607 = vmatmul.mubr.bf16.vlgmr.msra.gmra.mrb[0].mxu0 %v188_v13  ;;  %648 = vmatmul.mubr.bf16.vlgmr.msra.gmra.mrb[0].mxu1 %v188_v13 }
 0x1ce   : > { %v608_v14 = vpop.f32.mrb[0].mxu0  ;;  %v649_v15 = vpop.f32.mrb[0].mxu1 }
 0x1cf   : > { %v656_v16 = vmul.f32 20.0, %v608_v14  ;;  %v658_v17 = vmul.f32 20.0, %v649_v15  ;;  %v610_v18 = vpop.f32.mrb[1].mxu0  ;;  %v651_v19 = vpop.f32.mrb[1].mxu1 }
 0x1d0   : > { %v657_v1 = vmul.f32 20.0, %v610_v18  ;;  %v659_v0 = vmul.f32 20.0, %v651_v19  ;;  %v612_v20 = vpop.f32.mrb[2].mxu0  ;;  %v653_v21 = vpop.f32.mrb[2].mxu1 }
 0x1d1   : > { %660 = vst [vmem:[%s174_s28] sm:$0xff] %v656_v16  ;;  %662 = vst [vmem:[%s174_s28 + $0x10] sm:$0xff] %v658_v17  ;;  %v613_v22 = vpop.f32.mrb[3].mxu0  ;;  %v654_v23 = vpop.f32.mrb[3].mxu1 }
 0x1d2   : > { %661 = vst [vmem:[%s174_s28 + $0x8] sm:$0xff] %v657_v1  ;;  %663 = vst [vmem:[%s174_s28 + $0x18] sm:$0xff] %v659_v0 }
 0x1d3   : > { %1072 = shalt.err (!%p1069_p13)
}
 0x1d4   : > { %s1073_s19 = scalar_lea.hbm %s1381_s8, 512  ;;  %s1077_s4 = scalar_lea.hbm %s1427_s2, 1024 }
 0x1d5   : > { %p1074_p7 = scmp.ne.s32.totalorder %s1381_s8, %s1073_s19  ;;  %p1078_p1 = scmp.lt.u32.totalorder %s1381_s8, %s1427_s2 }
 0x1d6   : > { %p1079_p8 = scmp.lt.u32.totalorder %s1077_s4, %s1073_s19  ;;  %p1081_p9 = scmp.lt.u32.totalorder %s1073_s19, %s1381_s8 }
 0x1d7   : > { %p1075_p3 = pnand %p1074_p7, %p1446_p10 }
 0x1d8   : > { %p1080_p11 = por %p1079_p8, %p1078_p1 }
 0x1d9   : > { %p1076_p12 = pneg %p1075_p3 }
 0x1da   : > { %p1082_p2 = por %p1081_p9, %p1080_p11 }
 0x1dc   : > { %p1083_p4 = pnand %p1082_p2, %p1076_p12 }
 0x1de   : > { %1086 = shalt.err (!%p1083_p4)
}
 0x1df   : > { %849 = dma.vmem_to_hbm [thread:$0]  (%p1446_p10), %s1383_s30, 512, %s1381_s8, %s665_s13  }
 0x1e0 PF: > { %s691_s29 = sand.u32 1, %s1117_s9   ;;  %p1447_p5 = scmp.ne.s32.totalorder %s1436_s22, 0 }
 0x1e1   : > { %p1448_p0 = scmp.ge.s32.totalorder %s1129_s12, 2  ;;  %s692_s7 = scalar_lea.sflag [#allocation4], %s691_s29 }
 0x1e3   : > { %p860_p6 = pnand %p1448_p0, %p1447_p5 }
 0x1e5   : > { %1112 = dma.done.wait (!%p860_p6), %s692_s7, 512  }
 0x1e6   : > { %1114 = vsyncadd (!%p860_p6), %s692_s7, 4294966784  ;;  %p16_p13 = scmp.ge.s32.totalorder %s1177_s15, 4   ;;  %s1449_s9 = smov %s1121_s10 }
 0x1e7   : > { %s1450_s10 = smov %s1125_s11  ;;  %s1451_s11 = smov %s1189_s18 }
 0x1e8   : > { %s1452_s12 = smov %s1177_s15  ;;  %18 = sbr.rel (!%p16_p13) target bundleno = 6 (0x6), region = 78 }
 0x1ef   :  { %697 = vsyncpa [#allocation3], 1 }
 0x1f0   :  { %699 = vsyncpa [#allocation3 + $0x1], 1 }
 0x1f1   :  { %700 = vsyncpa [#allocation6], 1 }
 0x1f2   :  { %702 = vsyncpa [#allocation6 + $0x1], 1 }
 0x1f3   :  { %703 = vsyncpa [#allocation4], 1 }
 0x1f4   :  { %705 = vsyncpa [#allocation4 + $0x1], 1 }

</bundles_post_ra>
